<compile_context>
chip_gen: v7x
topology: tpu7x:2x2x1
jax: 0.10.0
libtpu: 0.0.40
codegen_flags: <defaults>
</compile_context>

<pallas_src>
import functools

import jax
import jax.numpy as jnp
from jax.experimental import pallas as pl
from jax.experimental.pallas import tpu as pltpu


def _focal_loss_kernel(x_ref, t_ref, alpha_ref, out_ref, *,
                       gamma, use_alpha, ragged, tile_rows, rows_total):
    x = x_ref[...].astype(jnp.float32)            # (C, TR, 128) logits
    t = t_ref[...]                                # (TR, 128) int32 targets

    # log_softmax over the class axis (leading axis -> VPU-only reductions).
    m = jnp.max(x, axis=0, keepdims=True)         # (1, TR, 128)
    z = x - m
    lse = jnp.log(jnp.sum(jnp.exp(z), axis=0, keepdims=True))
    logp = z - lse                                # (C, TR, 128)

    # Gather logp at the target class with a one-hot select over the class
    # axis.  Sentinel targets (== C, used for spatial padding) match no class
    # and therefore contribute exactly zero loss.
    cls = jax.lax.broadcasted_iota(jnp.int32, x.shape, 0)    # (C, TR, 128)
    tmask = cls == t[None, :, :]
    logpt = jnp.sum(jnp.where(tmask, logp, 0.0), axis=0)     # (TR, 128)
    pt = jnp.exp(logpt)

    if use_alpha:
        at = jnp.sum(jnp.where(tmask, alpha_ref[...].astype(jnp.float32), 0.0),
                     axis=0)                                  # (TR, 128)
        logpt = logpt * at

    one_m_pt = jnp.maximum(1.0 - pt, 0.0)   # clamp: avoids NaN for frac gamma
    if gamma == 0.0:
        loss = -logpt
    elif float(gamma).is_integer() and 0.0 < gamma <= 8.0:
        mod = one_m_pt
        for _ in range(int(gamma) - 1):
            mod = mod * one_m_pt
        loss = -mod * logpt
    else:
        loss = -(one_m_pt ** gamma) * logpt

    si = pl.program_id(1)
    if ragged:
        # Only the last spatial tile can run past R; mask (and pay the
        # iota/compare/select) only there.
        is_last = si == pl.num_programs(1) - 1

        @pl.when(is_last)
        def _():
            row = si * tile_rows + jax.lax.broadcasted_iota(
                jnp.int32, loss.shape, 0)
            masked = jnp.where(row < rows_total, loss, 0.0)
            out_ref[...] = jnp.sum(masked, keepdims=True)      # (1, 1)

        @pl.when(si != pl.num_programs(1) - 1)
        def _():
            out_ref[...] = jnp.sum(loss, keepdims=True)        # (1, 1)
    else:
        out_ref[...] = jnp.sum(loss, keepdims=True)            # (1, 1)


def _pick_tile_rows(c, r, itemsize, sublane_q, budget_bytes=20 << 20):
    """Largest spatial-row tile (rows of 128 lanes) whose live VMEM fits.

    Corrected accounting per row (= 128 lanes):
      logits : 2x double-buffered stored blocks + f32 upcast copy + ~3
               block-sized f32 temporaries around the class-axis passes
      pixels : 2x double-buffered int32 targets + ~4 f32 per-pixel temps
    """
    per_row = c * 128 * (2 * itemsize + 4 + 3 * 4) + 128 * (2 * 4 + 4 * 4)
    tr = int(budget_bytes // per_row)
    if tr >= r:
        return r
    tr = max(sublane_q, (tr // sublane_q) * sublane_q)
    # Prefer a tile that divides R exactly (drops the ragged last-tile path),
    # as long as it costs at most a 2x tile shrink.
    cand = tr
    while cand >= max(sublane_q, tr // 2):
        if r % cand == 0:
            return cand
        cand -= sublane_q
    return tr


def focal_loss(logits_nchw, target_nhw, *, gamma=0.0, alpha=None,
               size_average=True, tile_rows=None):
    """Pallas TPU focal loss.

    logits_nchw: (N, C, H, W) float logits (PyTorch NCHW convention).
    target_nhw:  (N, H, W) integer class indices.
    """
    n, c, h, w = logits_nchw.shape
    s = h * w
    itemsize = jnp.dtype(logits_nchw.dtype).itemsize
    sublane_q = 16 if itemsize < 4 else 8   # bf16 packs 2 rows / sublane

    use_alpha = alpha is not None
    if isinstance(alpha, (float, int)) and not isinstance(alpha, bool):
        alpha_vec = jnp.asarray([alpha, 1.0 - alpha], dtype=jnp.float32)
    elif alpha is None:
        alpha_vec = jnp.ones((c,), dtype=jnp.float32)
    else:
        alpha_vec = jnp.asarray(alpha, dtype=jnp.float32).reshape(-1)
    if use_alpha and alpha_vec.shape[0] != c:
        # TODO(synk): scalar alpha with C != 2 only works in PyTorch when every
        # target is < len(alpha); we require len(alpha) == C instead.
        raise ValueError(
            f"alpha must have length C={c}; got {alpha_vec.shape[0]}")
    alpha_3d = alpha_vec.reshape(c, 1, 1)

    # Fold H,W -> S (free metadata reshape: H and W are contiguous in NCHW).
    x = logits_nchw.reshape(n, c, s)
    t = target_nhw.reshape(n, s).astype(jnp.int32)

    # Make the lane axis 128-dense.  Padded positions get the sentinel target
    # class C, which produces exactly-zero loss inside the kernel.
    s_pad = ((s + 127) // 128) * 128
    if s_pad != s:
        # One extra pad pass over the logits; only hit when H*W % 128 != 0.
        x = jnp.pad(x, ((0, 0), (0, 0), (0, s_pad - s)))
        t = jnp.pad(t, ((0, 0), (0, s_pad - s)), constant_values=c)
    r = s_pad // 128
    x = x.reshape(n, c, r, 128)
    t = t.reshape(n, r, 128)

    if tile_rows is None:
        tile_rows = _pick_tile_rows(c, r, itemsize, sublane_q)
        # Megacore: when N == 1 give the spatial axis two cells to split
        # across the two TensorCores (only when it stays ragged-free).
        if n == 1 and tile_rows >= r and r % (2 * sublane_q) == 0:
            tile_rows = r // 2
    tile_rows = int(min(tile_rows, r))
    grid_s = pl.cdiv(r, tile_rows)
    ragged = (r % tile_rows) != 0

    # Corrected VMEM working-set estimate; cap the limit below v7x's 64 MiB
    # physical VMEM (v5e/v6e have 128 MiB, so 48 MiB is always safe).
    working_set = (c * tile_rows * 128 * (2 * itemsize + 4 + 3 * 4)
                   + tile_rows * 128 * (2 * 4 + 4 * 4))
    vmem_limit = int(min(max(working_set + (8 << 20), 32 << 20), 48 << 20))

    cost = pl.CostEstimate(
        flops=int(8 * n * c * s_pad + 12 * n * s_pad),
        transcendentals=int(n * s_pad * (c + 2)),
        bytes_accessed=int(n * c * s_pad * itemsize + n * s_pad * 4
                           + n * grid_s * 4 + c * 4),
    )

    kernel = functools.partial(
        _focal_loss_kernel, gamma=float(gamma), use_alpha=use_alpha,
        ragged=ragged, tile_rows=tile_rows, rows_total=r)

    partials = pl.pallas_call(
        kernel,
        out_shape=jax.ShapeDtypeStruct((n, grid_s, 1, 1), jnp.float32),
        grid_spec=pltpu.PrefetchScalarGridSpec(
            num_scalar_prefetch=0,
            grid=(n, grid_s),
            in_specs=[
                pl.BlockSpec((None, c, tile_rows, 128),
                             lambda ni, si: (ni, 0, si, 0)),
                pl.BlockSpec((None, tile_rows, 128),
                             lambda ni, si: (ni, si, 0)),
                pl.BlockSpec((c, 1, 1), lambda ni, si: (0, 0, 0)),
            ],
            out_specs=pl.BlockSpec((None, None, 1, 1),
                                   lambda ni, si: (ni, si, 0, 0)),
        ),
        compiler_params=pltpu.CompilerParams(
            dimension_semantics=("parallel", "parallel"),
            vmem_limit_bytes=vmem_limit),
        cost_estimate=cost,
    )(x, t, alpha_3d)

    loss_sum = jnp.sum(partials)
    if size_average:
        return loss_sum / jnp.float32(n * h * w)
    return loss_sum


def _focal_loss_ref(logits_nchw, target_nhw, gamma, alpha, size_average):
    n, c, h, w = logits_nchw.shape
    x = jnp.transpose(logits_nchw, (0, 2, 3, 1)).reshape(-1, c).astype(jnp.float32)
    t = target_nhw.reshape(-1).astype(jnp.int32)
    logp = jax.nn.log_softmax(x, axis=-1)
    logpt = jnp.take_along_axis(logp, t[:, None], axis=1)[:, 0]
    pt = jnp.exp(logpt)
    if alpha is not None:
        a = jnp.asarray(alpha, dtype=jnp.float32)
        logpt = logpt * a[t]
    loss = -((1.0 - pt) ** gamma) * logpt
    return loss.mean() if size_average else loss.sum()


if __name__ == "__main__":
    key = jax.random.PRNGKey(0)
    k1, k2, k3, k4 = jax.random.split(key, 4)

    # Case 1: gamma=2, per-class alpha, mean reduction.
    N, C, H, W = 2, 4, 16, 16
    gamma = 2.0
    alpha = [0.1, 0.2, 0.3, 0.4]
    logits = jax.random.normal(k1, (N, C, H, W), dtype=jnp.float32)
    target = jax.random.randint(k2, (N, H, W), 0, C, dtype=jnp.int32)

    out = jax.block_until_ready(
        focal_loss(logits, target, gamma=gamma, alpha=alpha, size_average=True))
    ref = _focal_loss_ref(logits, target, gamma, alpha, True)
    assert jnp.allclose(out, ref, rtol=1e-5, atol=1e-6), (out, ref)

    # Case 2: gamma=0, no alpha, sum reduction.
    out2 = jax.block_until_ready(
        focal_loss(logits, target, gamma=0.0, alpha=None, size_average=False))
    ref2 = _focal_loss_ref(logits, target, 0.0, None, False)
    assert jnp.allclose(out2, ref2, rtol=1e-5, atol=1e-5), (out2, ref2)

    # Case 3: non-128-multiple spatial extent (exercises the sentinel-padded
    # lane tail) + fractional gamma (pow path).
    N3, C3, H3, W3 = 1, 3, 10, 10
    logits3 = jax.random.normal(k3, (N3, C3, H3, W3), dtype=jnp.float32)
    target3 = jax.random.randint(k4, (N3, H3, W3), 0, C3, dtype=jnp.int32)
    out3 = jax.block_until_ready(
        focal_loss(logits3, target3, gamma=1.5, alpha=None, size_average=True))
    ref3 = _focal_loss_ref(logits3, target3, 1.5, None, True)
    assert jnp.allclose(out3, ref3, rtol=1e-5, atol=1e-6), (out3, ref3)

    print("KERNEL_OK")
</pallas_src>

<mosaic_0001>
module attributes {stable_mosaic.version = 11 : i64} {
  func.func @_focal_loss_kernel(%arg0: i32, %arg1: i32, %arg2: memref<1x4x2x128xf32, #tpu.memory_space<vmem>>, %arg3: memref<1x2x128xi32, #tpu.memory_space<vmem>>, %arg4: memref<4x1x1xf32, #tpu.memory_space<vmem>>, %arg5: memref<1x1x1x1xf32, #tpu.memory_space<vmem>>) attributes {dimension_semantics = [#tpu.dimension_semantics<parallel>, #tpu.dimension_semantics<parallel>], iteration_bounds = array<i64: 2, 1>, scalar_prefetch = 0 : i64, scratch_operands = 0 : i64, tpu.core_type = #tpu.core_type<tc>, window_params = [{transform_indices = @transform_0, window_bounds = array<i64: 1, 4, 2, 128>}, {transform_indices = @transform_1, window_bounds = array<i64: 1, 2, 128>}, {pipeline_mode = #tpu.pipeline_mode<synchronous>, transform_indices = @transform_2, window_bounds = array<i64: 4, 1, 1>}, {transform_indices = @transform_3, window_bounds = array<i64: 1, 1, 1, 1>}]} {
    %c0 = arith.constant 0 : index
    %c0_0 = arith.constant 0 : index
    %c0_1 = arith.constant 0 : index
    %c0_2 = arith.constant 0 : index
    %0 = vector.load %arg2[%c0, %c0_0, %c0_1, %c0_2] : memref<1x4x2x128xf32, #tpu.memory_space<vmem>>, vector<1x4x2x128xf32>
    %1 = vector.shape_cast %0 : vector<1x4x2x128xf32> to vector<4x2x128xf32>
    %c0_3 = arith.constant 0 : index
    %c0_4 = arith.constant 0 : index
    %c0_5 = arith.constant 0 : index
    %2 = vector.load %arg3[%c0_3, %c0_4, %c0_5] : memref<1x2x128xi32, #tpu.memory_space<vmem>>, vector<1x2x128xi32>
    %3 = vector.shape_cast %2 : vector<1x2x128xi32> to vector<2x128xi32>
    %cst = arith.constant dense<0xFF800000> : vector<2x128xf32>
    %4 = vector.multi_reduction <maximumf>, %1, %cst [0] : vector<4x2x128xf32> to vector<2x128xf32>
    %5 = vector.shape_cast %4 : vector<2x128xf32> to vector<1x2x128xf32>
    %6 = vector.broadcast %5 : vector<1x2x128xf32> to vector<4x2x128xf32>
    %7 = arith.subf %1, %6 : vector<4x2x128xf32>
    %8 = math.exp %7 : vector<4x2x128xf32>
    %cst_6 = arith.constant dense<0.000000e+00> : vector<2x128xf32>
    %9 = vector.multi_reduction <add>, %8, %cst_6 [0] : vector<4x2x128xf32> to vector<2x128xf32>
    %10 = vector.shape_cast %9 : vector<2x128xf32> to vector<1x2x128xf32>
    %11 = math.log %10 : vector<1x2x128xf32>
    %12 = vector.broadcast %11 : vector<1x2x128xf32> to vector<4x2x128xf32>
    %13 = arith.subf %7, %12 : vector<4x2x128xf32>
    %14 = tpu.iota {dimensions = array<i32: 0>} : vector<4x2x128xi32>
    %15 = vector.shape_cast %3 : vector<2x128xi32> to vector<1x2x128xi32>
    %16 = vector.broadcast %15 : vector<1x2x128xi32> to vector<4x2x128xi32>
    %17 = arith.cmpi eq, %14, %16 : vector<4x2x128xi32>
    %cst_7 = arith.constant 0.000000e+00 : f32
    %18 = vector.broadcast %cst_7 : f32 to vector<4x2x128xf32>
    %19 = arith.select %17, %13, %18 : vector<4x2x128xi1>, vector<4x2x128xf32>
    %cst_8 = arith.constant dense<0.000000e+00> : vector<2x128xf32>
    %20 = vector.multi_reduction <add>, %19, %cst_8 [0] : vector<4x2x128xf32> to vector<2x128xf32>
    %21 = math.exp %20 : vector<2x128xf32>
    %c0_9 = arith.constant 0 : index
    %c0_10 = arith.constant 0 : index
    %c0_11 = arith.constant 0 : index
    %22 = vector.load %arg4[%c0_9, %c0_10, %c0_11] : memref<4x1x1xf32, #tpu.memory_space<vmem>>, vector<4x1x1xf32>
    %cst_12 = arith.constant 0.000000e+00 : f32
    %23 = vector.shape_cast %22 : vector<4x1x1xf32> to vector<4x1x1xf32>
    %24 = vector.broadcast %23 : vector<4x1x1xf32> to vector<4x2x128xf32>
    %25 = vector.broadcast %cst_12 : f32 to vector<4x2x128xf32>
    %26 = arith.select %17, %24, %25 : vector<4x2x128xi1>, vector<4x2x128xf32>
    %cst_13 = arith.constant dense<0.000000e+00> : vector<2x128xf32>
    %27 = vector.multi_reduction <add>, %26, %cst_13 [0] : vector<4x2x128xf32> to vector<2x128xf32>
    %28 = arith.mulf %20, %27 : vector<2x128xf32>
    %cst_14 = arith.constant 1.000000e+00 : f32
    %29 = vector.broadcast %cst_14 : f32 to vector<2x128xf32>
    %30 = arith.subf %29, %21 : vector<2x128xf32>
    %cst_15 = arith.constant 0.000000e+00 : f32
    %31 = vector.broadcast %cst_15 : f32 to vector<2x128xf32>
    %32 = arith.maximumf %30, %31 : vector<2x128xf32>
    %33 = arith.mulf %32, %32 : vector<2x128xf32>
    %cst_16 = arith.constant 0.000000e+00 : f32
    %34 = vector.broadcast %cst_16 : f32 to vector<2x128xf32>
    %35 = arith.subf %34, %33 : vector<2x128xf32>
    %36 = arith.mulf %35, %28 : vector<2x128xf32>
    %37 = vector.shape_cast %36 : vector<2x128xf32> to vector<1x2x128xf32>
    %cst_17 = arith.constant dense<0.000000e+00> : vector<1xf32>
    %38 = vector.multi_reduction <add>, %37, %cst_17 [1, 2] : vector<1x2x128xf32> to vector<1xf32>
    %39 = vector.shape_cast %38 : vector<1xf32> to vector<1x1x1xf32>
    %40 = vector.extract %39[0, 0, 0] : f32 from vector<1x1x1xf32>
    %41 = vector.broadcast %40 : f32 to vector<1x1xf32>
    %c0_18 = arith.constant 0 : index
    %c0_19 = arith.constant 0 : index
    %c0_20 = arith.constant 0 : index
    %c0_21 = arith.constant 0 : index
    %42 = vector.load %arg5[%c0_18, %c0_19, %c0_20, %c0_21] : memref<1x1x1x1xf32, #tpu.memory_space<vmem>>, vector<1x1x1x1xf32>
    %43 = vector.shape_cast %42 : vector<1x1x1x1xf32> to vector<1x1xf32>
    %44 = vector.shape_cast %41 : vector<1x1xf32> to vector<1x1x1x1xf32>
    tpu.vector_store %arg5[%c0_18, %c0_19, %c0_20, %c0_21], %44 {strides = array<i32>} : memref<1x1x1x1xf32, #tpu.memory_space<vmem>>, vector<1x1x1x1xf32>,
    return
  }
  func.func @transform_0(%arg0: i32, %arg1: i32) -> (i32, i32, i32, i32) {
    %c0_i32 = arith.constant 0 : i32
    %c0_i32_0 = arith.constant 0 : i32
    %c0_i32_1 = arith.constant 0 : i32
    return %arg0, %c0_i32, %arg1, %c0_i32_0 : i32, i32, i32, i32
  }
  func.func @transform_1(%arg0: i32, %arg1: i32) -> (i32, i32, i32) {
    %c0_i32 = arith.constant 0 : i32
    %c0_i32_0 = arith.constant 0 : i32
    return %arg0, %arg1, %c0_i32 : i32, i32, i32
  }
  func.func @transform_2(%arg0: i32, %arg1: i32) -> (i32, i32, i32) {
    %c0_i32 = arith.constant 0 : i32
    %c0_i32_0 = arith.constant 0 : i32
    %c0_i32_1 = arith.constant 0 : i32
    %c0_i32_2 = arith.constant 0 : i32
    return %c0_i32, %c0_i32_0, %c0_i32_1 : i32, i32, i32
  }
  func.func @transform_3(%arg0: i32, %arg1: i32) -> (i32, i32, i32, i32) {
    %c0_i32 = arith.constant 0 : i32
    %c0_i32_0 = arith.constant 0 : i32
    %c0_i32_1 = arith.constant 0 : i32
    return %arg0, %arg1, %c0_i32, %c0_i32_0 : i32, i32, i32, i32
  }
}

</mosaic_0001>

<bundles_post_ra>
// kernel: tpu_custom_call.1
= control target key start
LH: loop header
LB: loop body
LE: loop exit
PB: predicated region body
PF: predicated region fallthrough
CT: control target
= control target key end

     0   :  { %8 = vsyncpa [#allocation3], 0  ;;  %s822_s0 = inlined_call_operand.hbm [shape: f32[2,4,2,128], index: 0, kind: input, shape index: {}]   ;;  %s823_s1 = inlined_call_operand.vmem [shape: s32[2,2,128], index: 1, kind: input, shape index: {}]   ;;  %s824_s2 = inlined_call_operand.vmem [shape: f32[4,1,1], index: 2, kind: input, shape index: {}]   ;;  %s825_s3 = inlined_call_operand.vmem [shape: f32[2,1,1,1], index: 3, kind: output, shape index: {}]  }
   0x1   :  { %10 = vsyncpa [#allocation3 + $0x1], 0  ;;  %s654_s12 = smov 0   ;;  %s656_s13 = smov 0  }
   0x2   :  { %s658_s14 = smov 0   ;;  %s660_s15 = smov 0  }
   0x3   :  { %s662_s16 = smov 0   ;;  %s664_s17 = smov 0  }
   0x4 LB: > { %s457_s18 = sadd.s32 4294967295, %s628_s17   ;;  %s28_s19 = sadd.s32 1, %s624_s16  ;;  %s628_s17 = sphi %s664_s17, %s16_s17   ;;  %s624_s16 = sphi %s662_s16, %s833_s16   ;;  %s620_s15 = sphi %s660_s15, %s832_s15   ;;  %s616_s14 = sphi %s658_s14, %s831_s14   ;;  %s612_s13 = sphi %s656_s13, %s830_s13   ;;  %s608_s12 = sphi %s654_s12, %s829_s12  }
   0x5   : > { %p30_p0 = scmp.ge.s32.totalorder %s28_s19, 2  ;;  %s37_s20 = sadd.s32 1, %s616_s14 }
   0x6   : > { %p44_p1 = scmp.ne.s32.totalorder %s616_s14, %s612_s13  ;;  %p45_p2 = scmp.eq.s32.totalorder %s628_s17, 0 }
   0x7   : > { %s835_s19 = smov (%p30_p0, %s28_s19), 0  ;;  %p50_p4 = scmp.ne.s32.totalorder %s612_s13, %s608_s12 }
   0x8   : > { %p690_p3 = por %p45_p2, %p44_p1  ;;  %s32_s22 = ssub.s32 %s624_s16, %s835_s19 }
   0x9   : > { %p51_p5 = scmp.eq.s32.totalorder %s457_s18, 0  ;;  %p35_p6 = scmp.eq.s32.totalorder %s32_s22, 0 }
   0xa   : > { %p482_p8 = scmp.lt.s32.totalorder %s628_s17, 2  ;;  %s154_s25 = sand.u32 1, %s616_s14  }
   0xb   : > { %p697_p7 = por %p51_p5, %p50_p4  ;;  %s473_s26 = sshll.u32 %s624_s16, 7 }
   0xc   : > { %s703_s24 = scalar_select %p35_p6, %s616_s14, %s37_s20  }
   0xd   : > { %s461_s27 = sshll.u32 %s154_s25, 3  ;;  %s710_s30 = scalar_lea.hbm %s822_s0, %s473_s26 }
   0xe   : > { %s158_s4 = scalar_lea.vmem [#allocation2], %s461_s27  ;;  %p714_p9 = pnand %p482_p8, %p690_p3 }
   0xf   : > { %s166_s5 = sshll.u32 %s158_s4, 4  ;;  %s720_s7 = scalar_lea.sflag [#allocation3], %s154_s25  ;;  %s718_s5 = int_to_ptr.vmem [resolvable:$true] %s166_s5 }
  0x10   : > { %s548_s8 = scalar_lea.hbm %s710_s30, 128  ;;  %p550_p11 = pneg %p714_p9 }
  0x11   : > { %p549_p10 = scmp.ne.s32.totalorder %s710_s30, %s548_s8  ;;  %s553_s11 = scalar_lea.hbm %s822_s0, 256 }
  0x12   : > { %p554_p0 = scmp.lt.u32.totalorder %s710_s30, %s822_s0  ;;  %p555_p1 = scmp.lt.u32.totalorder %s553_s11, %s548_s8 }
  0x13   : > { %p551_p12 = pnand %p550_p11, %p549_p10  ;;  %p557_p3 = scmp.lt.u32.totalorder %s548_s8, %s710_s30 }
  0x14   : > { %p556_p2 = por %p555_p1, %p554_p0 }
  0x15   : > { %p552_p13 = pneg %p551_p12 }
  0x16   : > { %p558_p4 = por %p557_p3, %p556_p2 }
  0x18   : > { %p559_p5 = pnand %p558_p4, %p552_p13 }
  0x1a   : > { %562 = shalt.err (!%p559_p5)
}
  0x1b   : > { %s563_s20 = scalar_lea.vmem %s718_s5, 128  ;;  %s630_s21 = smov [#allocation2]  }
  0x1c   : > { %p564_p6 = scmp.ne.s32.totalorder %s718_s5, %s563_s20  ;;  %s568_s22 = sshll.u32 %s630_s21, 4  ;;  %s569_s22 = int_to_ptr.vmem [resolvable:$false] %s568_s22 }
  0x1d   : > { %s570_s25 = scalar_lea.vmem %s569_s22, 256  ;;  %p571_p12 = scmp.lt.s32.totalorder %s718_s5, %s569_s22 }
  0x1e   : > { %p566_p8 = pnand %p564_p6, %p550_p11  ;;  %p572_p0 = scmp.lt.s32.totalorder %s570_s25, %s563_s20 }
  0x20   : > { %p567_p10 = pneg %p566_p8  ;;  %p573_p1 = por %p572_p0, %p571_p12 }
  0x22   : > { %p574_p2 = pnand %p573_p1, %p567_p10 }
  0x24   : > { %577 = shalt.err (!%p574_p2)
}
  0x25   : > { %s631_s26 = smov 32   ;;  %s632_s27 = smov 2  }
  0x26   : > { %481 = dma.hbm_to_vmem [thread:$0]  (!%p714_p9), %s710_s30, 128, %s718_s5, %s720_s7, %s631_s26, %s631_s26, %s632_s27  }
  0x27   : > { %p464_p11 = scmp.ge.s32.totalorder %s628_s17, 1  ;;  %p184_p13 = scmp.lt.s32.totalorder %s628_s17, 3 }
  0x29   : > { %p185_p3 = pnand %p464_p11, %p184_p13 }
  0x2a   : > { %s190_s28 = sand.u32 (!%p185_p3), 1, %s612_s13  }
  0x2b   : > { %188 = sbr.rel (%p185_p3) target bundleno = 404 (0x194), region = 32  ;;  %s465_s29 = sshll.u32 (!%p185_p3), %s190_s28, 3 }
  0x2c   : > { %s191_s4 = scalar_lea.sflag (!%p185_p3), [#allocation3], %s190_s28  ;;  %s194_s8 = scalar_lea.vmem (!%p185_p3), [#allocation2], %s465_s29 }
  0x32   : > { %603 = dma.done.wait (%p697_p7), %s191_s4, 128  }
  0x33   : > { %605 = vsyncadd (%p697_p7), %s191_s4, 4294967168  ;;  %v633_v0 = vmov 0   ;;  %v469_v1 = vld [vmem:[%s824_s2 + $0x2] ss:$0 sm:$0xff]  ;;  %v467_v2 = vld [vmem:[%s824_s2] ss:$0 sm:$0xff] }
  0x34   : > { %535 = vset.pattern.permute.xlu1 %v633_v0  ;;  %534 = vset.pattern.permute.xlu0 %v633_v0  ;;  %v470_v3 = vld [vmem:[%s824_s2 + $0x3] ss:$0 sm:$0xff]  ;;  %v468_v4 = vld [vmem:[%s824_s2 + $0x1] ss:$0 sm:$0xff]  ;;  %vm243_vm0 = vcmask 1041408   ;;  %p225_p7 = scmp.lt.s32.totalorder %s620_s15, 1 }
  0x35   : > { %326 = vperm.xlu1 %535, %v469_v1   ;;  %318 = vperm.xlu0 %534, %v467_v2   ;;  %v238_v5 = vld [vmem:[%s194_s8] sm:$0x3]  ;;  %v239_v6 = vld [vmem:[%s194_s8 + $0x2] sm:$0x3]  ;;  %v240_v7 = vld [vmem:[%s194_s8 + $0x4] sm:$0x3] }
  0x36   : > { %v241_v8 = vld [vmem:[%s194_s8 + $0x6] sm:$0x3]  ;;  %v244_v9 = vsel %vm243_vm0, %v238_v5, -inf  ;;  %v245_v10 = vsel %vm243_vm0, %v239_v6, -inf  ;;  %v246_v11 = vsel %vm243_vm0, %v240_v7, -inf  ;;  %s837_s15 = smov (!%p225_p7, %s620_s15), 1 }
  0x37   : > { %v247_v12 = vsel %vm243_vm0, %v241_v8, -inf  ;;  %v248_v13 = vmax.f32 %v244_v9, %v245_v10  ;;  %s466_s12 = sshll.u32 %s837_s15, 1  ;;  %s237_s26 = scalar_lea.vmem %s825_s3, %s837_s15  ;;  %vm361_vm5 = vcmask 0  }
  0x38   : > { %v249_v14 = vmax.f32 %v246_v11, %v247_v12  ;;  %s231_s21 = scalar_lea.vmem %s823_s1, %s466_s12 }
  0x39   : > { %330 = vperm.xlu1 %535, %v470_v3   ;;  %322 = vperm.xlu0 %534, %v468_v4   ;;  %v242_v37 = vld [vmem:[%s231_s21] sm:$0x3] }
  0x3a   : > { %v250_v15 = vmax.f32 %v248_v13, %v249_v14  ;;  %vm276_vm1 = vcmp.eq.s32.totalorder %v242_v37, 0  ;;  %vm277_vm2 = vcmp.eq.s32.totalorder %v242_v37, 1  ;;  %vm278_vm3 = vcmp.eq.s32.totalorder %v242_v37, 2 }
  0x3b   : > { %vm279_vm4 = vcmp.eq.s32.totalorder %v242_v37, 3 }
  0x3c   : > { %v251_v16 = vsub.f32 %v238_v5, %v250_v15  ;;  %v252_v17 = vsub.f32 %v239_v6, %v250_v15  ;;  %v253_v19 = vsub.f32 %v240_v7, %v250_v15  ;;  %v254_v21 = vsub.f32 %v241_v8, %v250_v15 }
  0x3e   : > { %v255_v18 = vmul.f32 1.442695, %v251_v16  ;;  %v257_v20 = vmul.f32 1.442695, %v252_v17  ;;  %v259_v22 = vmul.f32 1.442695, %v253_v19 }
  0x3f   : > { %v261_v23 = vmul.f32 1.442695, %v254_v21 }
  0x40   : > { %536 = vpow2.f32 %v255_v18 }
  0x41   : > { %538 = vpow2.f32 %v257_v20 }
  0x42   : > { %540 = vpow2.f32 %v259_v22 }
  0x43   : > { %542 = vpow2.f32 %v261_v23 }
  0x4a   : > { %v537_v24 = vpop.eup %536 }
  0x4b   : > { %v539_v25 = vpop.eup %538  ;;  %v263_v26 = vsel %vm243_vm0, %v537_v24, 0.0 }
  0x4c   : > { %v264_v27 = vsel %vm243_vm0, %v539_v25, 0.0  ;;  %v541_v28 = vpop.eup %540 }
  0x4d   : > { %v265_v29 = vadd.f32 %v264_v27, %v263_v26  ;;  %v266_v30 = vsel %vm243_vm0, %v541_v28, 0.0  ;;  %v543_v31 = vpop.eup %542 }
  0x4e   : > { %v268_v33 = vsel %vm243_vm0, %v543_v31, 0.0 }
  0x4f   : > { %v267_v32 = vadd.f32 %v266_v30, %v265_v29 }
  0x51   : > { %v269_v34 = vadd.f32 %v268_v33, %v267_v32 }
  0x53   : > { %544 = vlog2.f32 %v269_v34 }
  0x5d   : > { %v545_v35 = vpop.eup %544 }
  0x5e   : > { %v271_v36 = vmul.f32 0.6931472, %v545_v35 }
  0x60   : > { %v272_v38 = vsub.f32 %v251_v16, %v271_v36  ;;  %v273_v39 = vsub.f32 %v252_v17, %v271_v36  ;;  %v274_v40 = vsub.f32 %v253_v19, %v271_v36  ;;  %v275_v46 = vsub.f32 %v254_v21, %v271_v36 }
  0x62   : > { %v280_v41 = vsel %vm276_vm1, %v272_v38, 0.0  ;;  %v281_v42 = vsel %vm277_vm2, %v273_v39, 0.0  ;;  %v282_v45 = vsel %vm278_vm3, %v274_v40, 0.0  ;;  %v283_v49 = vsel %vm279_vm4, %v275_v46, 0.0 }
  0x63   : > { %v284_v43 = vsel %vm243_vm0, %v280_v41, 0.0  ;;  %v285_v44 = vsel %vm243_vm0, %v281_v42, 0.0  ;;  %v287_v48 = vsel %vm243_vm0, %v282_v45, 0.0  ;;  %v289_v51 = vsel %vm243_vm0, %v283_v49, 0.0 }
  0x64   : > { %v286_v47 = vadd.f32 %v285_v44, %v284_v43 }
  0x66   : > { %v288_v50 = vadd.f32 %v287_v48, %v286_v47 }
  0x68   : > { %v290_v52 = vadd.f32 %v289_v51, %v288_v50 }
  0x6a   : > { %v291_v53 = vmul.f32 1.442695, %v290_v52 }
  0x6c   : > { %546 = vpow2.f32 %v291_v53 }
  0x76   : > { %v547_v54 = vpop.eup %546 }
  0x77   : > { %v345_v55 = vsub.f32 1.0, %v547_v54 }
  0x79   : > { %v346_v59 = vmax.f32 %v345_v55, 0.0 }
  0x7b   : > { %v347_v4 = vmul.f32 %v346_v59, %v346_v59 }
  0x7d   : > { %v348_v9 = vsub.f32 0.0, %v347_v4 }
  0xb4   : > { %v327_v56 = vpop.permute.xlu1 %326  ;;  %v319_v57 = vpop.permute.xlu0 %318 }
  0xb5   : > { %v333_v58 = vsel %vm276_vm1, %v319_v57, 0.0  ;;  %v335_v62 = vsel %vm278_vm3, %v327_v56, 0.0 }
  0xb6   : > { %v337_v0 = vsel %vm243_vm0, %v333_v58, 0.0  ;;  %v340_v5 = vsel %vm243_vm0, %v335_v62, 0.0 }
  0xb8   : > { %v331_v60 = vpop.permute.xlu1 %330  ;;  %v323_v61 = vpop.permute.xlu0 %322 }
  0xb9   : > { %v334_v63 = vsel %vm277_vm2, %v323_v61, 0.0  ;;  %v336_v2 = vsel %vm279_vm4, %v331_v60, 0.0 }
  0xba   : > { %v338_v1 = vsel %vm243_vm0, %v334_v63, 0.0  ;;  %v342_v7 = vsel %vm243_vm0, %v336_v2, 0.0 }
  0xbb   : > { %v339_v3 = vadd.f32 %v338_v1, %v337_v0 }
  0xbd   : > { %v341_v6 = vadd.f32 %v340_v5, %v339_v3 }
  0xbf   : > { %v343_v8 = vadd.f32 %v342_v7, %v341_v6 }
  0xc1   : > { %v344_v10 = vmul.f32 %v343_v8, %v290_v52 }
  0xc3   : > { %v349_v11 = vmul.f32 %v348_v9, %v344_v10 }
  0xc5   : > { %v350_v12 = vsel %vm243_vm0, %v349_v11, 0.0 }
  0xc6   : > { %351 = vadd.xlane.f32.xlu0 %v350_v12 }
 0x153   : > { %v352_v13 = vpop.xlane.xlu0 %351 }
 0x154   : > { %v353_v14 = vrot.slane %v352_v13, 4 }
 0x156   : > { %v354_v15 = vadd.f32 %v353_v14, %v352_v13 }
 0x158   : > { %v355_v16 = vrot.slane %v354_v15, 2 }
 0x15a   : > { %v356_v17 = vadd.f32 %v355_v16, %v354_v15 }
 0x15c   : > { %v357_v18 = vrot.slane %v356_v17, 1 }
 0x15e   : > { %v358_v19 = vadd.f32 %v357_v18, %v356_v17 }
 0x160   : > { %474 = vpush %v358_v19 }
 0x191   : > { %s475_s27 = spop %474 }
 0x192   : > { %v360_v20 = vstv %s475_s27 }
 0x193   : > { %362 = vst.msk [vmem:[%s237_s26] sm:$0x1] %vm361_vm5, %v360_v20 }
 0x194 PF: > { %s16_s17 = sadd.s32 1, %s628_s17   ;;  %s829_s12 = smov %s612_s13 }
 0x195   : > { %p13_p9 = scmp.ge.s32.totalorder %s16_s17, 4   ;;  %s830_s13 = smov %s616_s14 }
 0x196   : > { %s831_s14 = smov %s703_s24  ;;  %s832_s15 = smov %s624_s16 }
 0x197   : > { %s833_s16 = smov %s835_s19  ;;  %15 = sbr.rel (!%p13_p9) target bundleno = 4 (0x4), region = 75 }
 0x19e   :  { %386 = vsyncpa [#allocation3], 1 }
 0x19f   :  { %388 = vsyncpa [#allocation3 + $0x1], 1 }

</bundles_post_ra>
